<compile_context>
chip_gen: v7x
topology: tpu7x:2x2x1
jax: 0.10.0
libtpu: 0.0.40
codegen_flags: <defaults>
</compile_context>

<pallas_src>
import functools

import jax
import jax.numpy as jnp
from jax.experimental import pallas as pl
from jax.experimental.pallas import tpu as pltpu


# 3x3 taps in (dh, dw) order; tap index t = (dh + 1) * 3 + (dw + 1) = kh*3 + kw.
_TAPS = tuple((kh - 1, kw - 1) for kh in range(3) for kw in range(3))


def _silu(y):
    # SiLU(y) = y / (1 + exp(-y)).  exp and approx-reciprocal both go to the
    # EUP; the only VALU work per element is one add and one multiply.
    return y * pl.reciprocal(1.0 + jnp.exp(-y), approx=True)


def _residual_block_kernel(x_ref, w1_ref, b1_ref, w2_ref, b2_ref, mask_ref,
                           o_ref, stk_ref, *, W, Cp, HW):
    # x_ref:  (C, HW)    bf16     w1_ref: (Cp, C)   bf16    b1_ref: (Cp, 1) f32
    # w2_ref: (C, 9*Cp)  bf16     b2_ref: (C, 1)    f32     mask_ref: (9, 1, HW) f32
    # o_ref:  (C, HW)    bf16     stk_ref: (9*Cp, HW) bf16  (VMEM scratch)
    x = x_ref[...]

    # ---- conv1 (1x1, bias-free) + folded BN1 + SiLU (f32 accumulate) -------
    y1 = jnp.dot(w1_ref[...], x, preferred_element_type=jnp.float32)   # (Cp, HW)
    y1 = _silu(y1 + b1_ref[...])

    # ---- stack the 9 rolled + boundary-masked copies of y1 along sublanes --
    # stacked[t*Cp + i, p] = y1[i, p + dh*W + dw] (zero outside the image), so
    # the whole 3x3 conv collapses to a single MXU matmul with K = 9*Cp.
    for t, (dh, dw) in enumerate(_TAPS):
        s = dh * W + dw
        shifted = pltpu.roll(y1, shift=(-s) % HW, axis=1) if s != 0 else y1
        if (dh, dw) != (0, 0):
            shifted = shifted * mask_ref[t]        # multiplicative 0/1 mask
        stk_ref[pl.ds(t * Cp, Cp), :] = shifted.astype(stk_ref.dtype)

    # ---- conv2 (3x3, pad=1, bias-free) as ONE matmul + folded BN2 + SiLU ---
    y2 = jnp.dot(w2_ref[...], stk_ref[...], preferred_element_type=jnp.float32)
    y2 = _silu(y2 + b2_ref[...])

    # ---- residual add -------------------------------------------------------
    o_ref[...] = (x.astype(jnp.float32) + y2).astype(o_ref.dtype)


def _fold_bn(w, bn, eps):
    """Fold inference-mode BatchNorm (gamma, beta, mean, var) into a bias-free
    conv weight -> (w_eff, b_eff), f32."""
    gamma, beta, mean, var = bn
    scale = gamma / jnp.sqrt(var + eps)
    w_eff = w * scale.reshape((-1,) + (1,) * (w.ndim - 1))
    b_eff = beta - mean * scale
    return w_eff.astype(jnp.float32), b_eff.astype(jnp.float32)


def residual_block(x, w1, bn1, w2, bn2, eps=1e-5):
    """ResidualBlock forward: x + SiLU(BN2(conv3x3(SiLU(BN1(conv1x1(x)))))).

    x:  (B, C, H, W) NCHW, matching the PyTorch module.
    w1: (C, C)        1x1 conv weight (squeezed (C, C, 1, 1)), bias-free.
    w2: (C, C, 3, 3)  3x3 conv weight, bias-free.
    bn1/bn2: (gamma, beta, running_mean, running_var), each shape (C,).
    """
    B, C, H, W = x.shape
    HW = H * W
    # Intermediate (y1) channel pad: multiple of 16 so bf16 scratch writes stay
    # tile-aligned.  For realistic YOLO channel counts Cp == C.
    Cp = max(16, ((C + 15) // 16) * 16)

    w1_eff, b1_eff = _fold_bn(w1.astype(jnp.float32), bn1, eps)   # (C, C), (C,)
    w2_eff, b2_eff = _fold_bn(w2.astype(jnp.float32), bn2, eps)   # (C, C, 3, 3), (C,)

    # conv1: pad only the OUTPUT (intermediate) channels; x itself stays
    # unpadded, so padded y1 rows are exactly zero (SiLU(0) == 0).
    w1_p = jnp.pad(w1_eff, ((0, Cp - C), (0, 0))).astype(jnp.bfloat16)       # (Cp, C)
    b1_p = jnp.pad(b1_eff, (0, Cp - C)).reshape(Cp, 1).astype(jnp.float32)   # (Cp, 1)

    # conv2 weights as a single (C, 9*Cp) matrix: column block t = kh*3 + kw
    # holds tap (kh, kw); padded input-channel columns are zero.
    w2_t = jnp.transpose(w2_eff, (0, 2, 3, 1))                   # (Cout, kh, kw, Cin)
    w2_t = jnp.pad(w2_t, ((0, 0), (0, 0), (0, 0), (0, Cp - C)))  # (C, 3, 3, Cp)
    w2_s = w2_t.reshape(C, 9 * Cp).astype(jnp.bfloat16)          # (C, 9*Cp)
    b2_p = b2_eff.reshape(C, 1).astype(jnp.float32)              # (C, 1)

    # Zero-padding boundary masks for the 8 off-center taps, built once.
    flat = jnp.arange(HW, dtype=jnp.int32)
    h_idx, w_idx = flat // W, flat % W
    masks = []
    for dh, dw in _TAPS:
        m = jnp.ones((HW,), jnp.float32)
        if dh == -1:
            m = m * (h_idx >= 1)
        elif dh == 1:
            m = m * (h_idx < H - 1)
        if dw == -1:
            m = m * (w_idx >= 1)
        elif dw == 1:
            m = m * (w_idx < W - 1)
        masks.append(m)
    tap_mask = jnp.stack(masks).reshape(9, 1, HW).astype(jnp.float32)

    # No channel pad / slice of the activation tensor (saves two HBM round
    # trips); bf16 halves its HBM traffic and VMEM footprint.
    x_flat = x.reshape(B, C, HW).astype(jnp.bfloat16)

    kernel = functools.partial(_residual_block_kernel, W=W, Cp=Cp, HW=HW)

    out = pl.pallas_call(
        kernel,
        out_shape=jax.ShapeDtypeStruct((B, C, HW), jnp.bfloat16),
        grid_spec=pltpu.PrefetchScalarGridSpec(
            num_scalar_prefetch=0,
            grid=(B,),
            in_specs=[
                pl.BlockSpec((None, C, HW), lambda b: (b, 0, 0)),      # x
                pl.BlockSpec((Cp, C), lambda b: (0, 0)),               # w1
                pl.BlockSpec((Cp, 1), lambda b: (0, 0)),               # b1
                pl.BlockSpec((C, 9 * Cp), lambda b: (0, 0)),           # w2 (stacked)
                pl.BlockSpec((C, 1), lambda b: (0, 0)),                # b2
                pl.BlockSpec((9, 1, HW), lambda b: (0, 0, 0)),         # tap masks
            ],
            out_specs=pl.BlockSpec((None, C, HW), lambda b: (b, 0, 0)),
            scratch_shapes=[pltpu.VMEM((9 * Cp, HW), jnp.bfloat16)],
        ),
        compiler_params=pltpu.CompilerParams(
            dimension_semantics=("parallel",),        # batch steps split across TCs
            vmem_limit_bytes=64 * 1024 * 1024,        # headroom for realistic C / HW
        ),
    )(x_flat, w1_p, b1_p, w2_s, b2_p, tap_mask)

    return out.reshape(B, C, H, W)


def _reference(x, w1, bn1, w2, bn2, eps=1e-5):
    """Pure-JAX f32 reference mirroring the PyTorch forward (BN in eval mode)."""
    def bn(y, params):
        gamma, beta, mean, var = params
        inv = gamma / jnp.sqrt(var + eps)
        return ((y - mean[None, :, None, None]) * inv[None, :, None, None]
                + beta[None, :, None, None])

    y = jnp.einsum('oc,bchw->bohw', w1, x, precision=jax.lax.Precision.HIGHEST)
    y = jax.nn.silu(bn(y, bn1))
    y = jax.lax.conv_general_dilated(
        y, w2, window_strides=(1, 1), padding=((1, 1), (1, 1)),
        dimension_numbers=('NCHW', 'OIHW', 'NCHW'),
        precision=jax.lax.Precision.HIGHEST)
    y = jax.nn.silu(bn(y, bn2))
    return x + y


if __name__ == "__main__":
    B, C, H, W = 2, 4, 16, 16

    key = jax.random.PRNGKey(0)
    ks = jax.random.split(key, 11)

    x = jax.random.normal(ks[0], (B, C, H, W), dtype=jnp.float32)
    w1 = jax.random.normal(ks[1], (C, C), dtype=jnp.float32) * 0.3
    w2 = jax.random.normal(ks[2], (C, C, 3, 3), dtype=jnp.float32) * 0.2
    bn1 = (1.0 + 0.1 * jax.random.normal(ks[3], (C,), dtype=jnp.float32),
           0.1 * jax.random.normal(ks[4], (C,), dtype=jnp.float32),
           0.1 * jax.random.normal(ks[5], (C,), dtype=jnp.float32),
           jax.random.uniform(ks[6], (C,), dtype=jnp.float32,
                              minval=0.5, maxval=1.5))
    bn2 = (1.0 + 0.1 * jax.random.normal(ks[7], (C,), dtype=jnp.float32),
           0.1 * jax.random.normal(ks[8], (C,), dtype=jnp.float32),
           0.1 * jax.random.normal(ks[9], (C,), dtype=jnp.float32),
           jax.random.uniform(ks[10], (C,), dtype=jnp.float32,
                              minval=0.5, maxval=1.5))

    out = residual_block(x, w1, bn1, w2, bn2)
    out = jax.block_until_ready(out)

    ref = _reference(x, w1, bn1, w2, bn2)
    assert out.shape == (B, C, H, W), out.shape

    # bf16 activations/weights (f32 accumulate) vs f32 reference -> relaxed
    # tolerance; any structural bug (tap mapping, BN fold, masks) would blow
    # past this by orders of magnitude.
    out_f32 = out.astype(jnp.float32)
    max_err = float(jnp.max(jnp.abs(out_f32 - ref)))
    assert jnp.allclose(out_f32, ref, atol=1e-1, rtol=5e-2), f"mismatch: {max_err}"

    print("KERNEL_OK")
</pallas_src>

<mosaic_0001>
module attributes {stable_mosaic.version = 11 : i64} {
  func.func @_residual_block_kernel(%arg0: i32, %arg1: memref<1x4x256xbf16, #tpu.memory_space<vmem>>, %arg2: memref<16x4xbf16, #tpu.memory_space<vmem>>, %arg3: memref<16x1xf32, #tpu.memory_space<vmem>>, %arg4: memref<4x144xbf16, #tpu.memory_space<vmem>>, %arg5: memref<4x1xf32, #tpu.memory_space<vmem>>, %arg6: memref<9x1x256xf32, #tpu.memory_space<vmem>>, %arg7: memref<1x4x256xbf16, #tpu.memory_space<vmem>>, %arg8: memref<144x256xbf16, #tpu.memory_space<vmem>>) attributes {dimension_semantics = [#tpu.dimension_semantics<parallel>], iteration_bounds = array<i64: 2>, scalar_prefetch = 0 : i64, scratch_operands = 1 : i64, tpu.core_type = #tpu.core_type<tc>, window_params = [{transform_indices = @transform_0, window_bounds = array<i64: 1, 4, 256>}, {pipeline_mode = #tpu.pipeline_mode<synchronous>, transform_indices = @transform_1, window_bounds = array<i64: 16, 4>}, {pipeline_mode = #tpu.pipeline_mode<synchronous>, transform_indices = @transform_2, window_bounds = array<i64: 16, 1>}, {pipeline_mode = #tpu.pipeline_mode<synchronous>, transform_indices = @transform_3, window_bounds = array<i64: 4, 144>}, {pipeline_mode = #tpu.pipeline_mode<synchronous>, transform_indices = @transform_4, window_bounds = array<i64: 4, 1>}, {pipeline_mode = #tpu.pipeline_mode<synchronous>, transform_indices = @transform_5, window_bounds = array<i64: 9, 1, 256>}, {transform_indices = @transform_6, window_bounds = array<i64: 1, 4, 256>}]} {
    %c0 = arith.constant 0 : index
    %c0_0 = arith.constant 0 : index
    %c0_1 = arith.constant 0 : index
    %0 = vector.load %arg1[%c0, %c0_0, %c0_1] : memref<1x4x256xbf16, #tpu.memory_space<vmem>>, vector<1x4x256xbf16>
    %1 = vector.shape_cast %0 : vector<1x4x256xbf16> to vector<4x256xbf16>
    %c0_2 = arith.constant 0 : index
    %c0_3 = arith.constant 0 : index
    %2 = vector.load %arg2[%c0_2, %c0_3] : memref<16x4xbf16, #tpu.memory_space<vmem>>, vector<16x4xbf16>
    %cst = arith.constant dense<0.000000e+00> : vector<16x256xf32>
    %3 = tpu.matmul %2, %1, %cst {dimension_numbers = #tpu.dot_dimension_numbers<[1], [0], [0], [1], [0, 0, 1, 1], [], []>} : vector<16x4xbf16>, vector<4x256xbf16>, vector<16x256xf32> -> vector<16x256xf32>
    %c0_4 = arith.constant 0 : index
    %c0_5 = arith.constant 0 : index
    %4 = vector.load %arg3[%c0_4, %c0_5] : memref<16x1xf32, #tpu.memory_space<vmem>>, vector<16x1xf32>
    %5 = vector.broadcast %4 : vector<16x1xf32> to vector<16x256xf32>
    %6 = arith.addf %3, %5 : vector<16x256xf32>
    %cst_6 = arith.constant 0.000000e+00 : f32
    %7 = vector.broadcast %cst_6 : f32 to vector<16x256xf32>
    %8 = arith.subf %7, %6 : vector<16x256xf32>
    %9 = math.exp %8 : vector<16x256xf32>
    %cst_7 = arith.constant 1.000000e+00 : f32
    %10 = vector.broadcast %cst_7 : f32 to vector<16x256xf32>
    %11 = arith.addf %10, %9 : vector<16x256xf32>
    %12 = tpu.reciprocal %11 {approx = true} : vector<16x256xf32> -> vector<16x256xf32>
    %13 = arith.mulf %6, %12 : vector<16x256xf32>
    %c17_i32 = arith.constant 17 : i32
    %14 = tpu.dynamic_rotate %13 by %c17_i32 dim 1 : vector<16x256xf32>, i32 -> vector<16x256xf32>
    %c0_8 = arith.constant 0 : index
    %c0_9 = arith.constant 0 : index
    %c0_10 = arith.constant 0 : index
    %15 = vector.load %arg6[%c0_8, %c0_9, %c0_10] : memref<9x1x256xf32, #tpu.memory_space<vmem>>, vector<1x1x256xf32>
    %16 = vector.shape_cast %15 : vector<1x1x256xf32> to vector<1x256xf32>
    %17 = vector.broadcast %16 : vector<1x256xf32> to vector<16x256xf32>
    %18 = arith.mulf %14, %17 : vector<16x256xf32>
    %19 = arith.truncf %18 : vector<16x256xf32> to vector<16x256xbf16>
    %c0_11 = arith.constant 0 : index
    %c0_12 = arith.constant 0 : index
    %20 = vector.load %arg8[%c0_11, %c0_12] : memref<144x256xbf16, #tpu.memory_space<vmem>>, vector<16x256xbf16>
    tpu.vector_store %arg8[%c0_11, %c0_12], %19 {strides = array<i32>} : memref<144x256xbf16, #tpu.memory_space<vmem>>, vector<16x256xbf16>,
    %c16_i32 = arith.constant 16 : i32
    %21 = tpu.dynamic_rotate %13 by %c16_i32 dim 1 : vector<16x256xf32>, i32 -> vector<16x256xf32>
    %c1 = arith.constant 1 : index
    %c0_13 = arith.constant 0 : index
    %c0_14 = arith.constant 0 : index
    %22 = vector.load %arg6[%c1, %c0_13, %c0_14] : memref<9x1x256xf32, #tpu.memory_space<vmem>>, vector<1x1x256xf32>
    %23 = vector.shape_cast %22 : vector<1x1x256xf32> to vector<1x256xf32>
    %24 = vector.broadcast %23 : vector<1x256xf32> to vector<16x256xf32>
    %25 = arith.mulf %21, %24 : vector<16x256xf32>
    %26 = arith.truncf %25 : vector<16x256xf32> to vector<16x256xbf16>
    %c16 = arith.constant 16 : index
    %c0_15 = arith.constant 0 : index
    %27 = vector.load %arg8[%c16, %c0_15] : memref<144x256xbf16, #tpu.memory_space<vmem>>, vector<16x256xbf16>
    tpu.vector_store %arg8[%c16, %c0_15], %26 {strides = array<i32>} : memref<144x256xbf16, #tpu.memory_space<vmem>>, vector<16x256xbf16>,
    %c15_i32 = arith.constant 15 : i32
    %28 = tpu.dynamic_rotate %13 by %c15_i32 dim 1 : vector<16x256xf32>, i32 -> vector<16x256xf32>
    %c2 = arith.constant 2 : index
    %c0_16 = arith.constant 0 : index
    %c0_17 = arith.constant 0 : index
    %29 = vector.load %arg6[%c2, %c0_16, %c0_17] : memref<9x1x256xf32, #tpu.memory_space<vmem>>, vector<1x1x256xf32>
    %30 = vector.shape_cast %29 : vector<1x1x256xf32> to vector<1x256xf32>
    %31 = vector.broadcast %30 : vector<1x256xf32> to vector<16x256xf32>
    %32 = arith.mulf %28, %31 : vector<16x256xf32>
    %33 = arith.truncf %32 : vector<16x256xf32> to vector<16x256xbf16>
    %c32 = arith.constant 32 : index
    %c0_18 = arith.constant 0 : index
    %34 = vector.load %arg8[%c32, %c0_18] : memref<144x256xbf16, #tpu.memory_space<vmem>>, vector<16x256xbf16>
    tpu.vector_store %arg8[%c32, %c0_18], %33 {strides = array<i32>} : memref<144x256xbf16, #tpu.memory_space<vmem>>, vector<16x256xbf16>,
    %c1_i32 = arith.constant 1 : i32
    %35 = tpu.dynamic_rotate %13 by %c1_i32 dim 1 : vector<16x256xf32>, i32 -> vector<16x256xf32>
    %c3 = arith.constant 3 : index
    %c0_19 = arith.constant 0 : index
    %c0_20 = arith.constant 0 : index
    %36 = vector.load %arg6[%c3, %c0_19, %c0_20] : memref<9x1x256xf32, #tpu.memory_space<vmem>>, vector<1x1x256xf32>
    %37 = vector.shape_cast %36 : vector<1x1x256xf32> to vector<1x256xf32>
    %38 = vector.broadcast %37 : vector<1x256xf32> to vector<16x256xf32>
    %39 = arith.mulf %35, %38 : vector<16x256xf32>
    %40 = arith.truncf %39 : vector<16x256xf32> to vector<16x256xbf16>
    %c48 = arith.constant 48 : index
    %c0_21 = arith.constant 0 : index
    %41 = vector.load %arg8[%c48, %c0_21] : memref<144x256xbf16, #tpu.memory_space<vmem>>, vector<16x256xbf16>
    tpu.vector_store %arg8[%c48, %c0_21], %40 {strides = array<i32>} : memref<144x256xbf16, #tpu.memory_space<vmem>>, vector<16x256xbf16>,
    %42 = arith.truncf %13 : vector<16x256xf32> to vector<16x256xbf16>
    %c64 = arith.constant 64 : index
    %c0_22 = arith.constant 0 : index
    %43 = vector.load %arg8[%c64, %c0_22] : memref<144x256xbf16, #tpu.memory_space<vmem>>, vector<16x256xbf16>
    tpu.vector_store %arg8[%c64, %c0_22], %42 {strides = array<i32>} : memref<144x256xbf16, #tpu.memory_space<vmem>>, vector<16x256xbf16>,
    %c255_i32 = arith.constant 255 : i32
    %44 = tpu.dynamic_rotate %13 by %c255_i32 dim 1 : vector<16x256xf32>, i32 -> vector<16x256xf32>
    %c5 = arith.constant 5 : index
    %c0_23 = arith.constant 0 : index
    %c0_24 = arith.constant 0 : index
    %45 = vector.load %arg6[%c5, %c0_23, %c0_24] : memref<9x1x256xf32, #tpu.memory_space<vmem>>, vector<1x1x256xf32>
    %46 = vector.shape_cast %45 : vector<1x1x256xf32> to vector<1x256xf32>
    %47 = vector.broadcast %46 : vector<1x256xf32> to vector<16x256xf32>
    %48 = arith.mulf %44, %47 : vector<16x256xf32>
    %49 = arith.truncf %48 : vector<16x256xf32> to vector<16x256xbf16>
    %c80 = arith.constant 80 : index
    %c0_25 = arith.constant 0 : index
    %50 = vector.load %arg8[%c80, %c0_25] : memref<144x256xbf16, #tpu.memory_space<vmem>>, vector<16x256xbf16>
    tpu.vector_store %arg8[%c80, %c0_25], %49 {strides = array<i32>} : memref<144x256xbf16, #tpu.memory_space<vmem>>, vector<16x256xbf16>,
    %c241_i32 = arith.constant 241 : i32
    %51 = tpu.dynamic_rotate %13 by %c241_i32 dim 1 : vector<16x256xf32>, i32 -> vector<16x256xf32>
    %c6 = arith.constant 6 : index
    %c0_26 = arith.constant 0 : index
    %c0_27 = arith.constant 0 : index
    %52 = vector.load %arg6[%c6, %c0_26, %c0_27] : memref<9x1x256xf32, #tpu.memory_space<vmem>>, vector<1x1x256xf32>
    %53 = vector.shape_cast %52 : vector<1x1x256xf32> to vector<1x256xf32>
    %54 = vector.broadcast %53 : vector<1x256xf32> to vector<16x256xf32>
    %55 = arith.mulf %51, %54 : vector<16x256xf32>
    %56 = arith.truncf %55 : vector<16x256xf32> to vector<16x256xbf16>
    %c96 = arith.constant 96 : index
    %c0_28 = arith.constant 0 : index
    %57 = vector.load %arg8[%c96, %c0_28] : memref<144x256xbf16, #tpu.memory_space<vmem>>, vector<16x256xbf16>
    tpu.vector_store %arg8[%c96, %c0_28], %56 {strides = array<i32>} : memref<144x256xbf16, #tpu.memory_space<vmem>>, vector<16x256xbf16>,
    %c240_i32 = arith.constant 240 : i32
    %58 = tpu.dynamic_rotate %13 by %c240_i32 dim 1 : vector<16x256xf32>, i32 -> vector<16x256xf32>
    %c7 = arith.constant 7 : index
    %c0_29 = arith.constant 0 : index
    %c0_30 = arith.constant 0 : index
    %59 = vector.load %arg6[%c7, %c0_29, %c0_30] : memref<9x1x256xf32, #tpu.memory_space<vmem>>, vector<1x1x256xf32>
    %60 = vector.shape_cast %59 : vector<1x1x256xf32> to vector<1x256xf32>
    %61 = vector.broadcast %60 : vector<1x256xf32> to vector<16x256xf32>
    %62 = arith.mulf %58, %61 : vector<16x256xf32>
    %63 = arith.truncf %62 : vector<16x256xf32> to vector<16x256xbf16>
    %c112 = arith.constant 112 : index
    %c0_31 = arith.constant 0 : index
    %64 = vector.load %arg8[%c112, %c0_31] : memref<144x256xbf16, #tpu.memory_space<vmem>>, vector<16x256xbf16>
    tpu.vector_store %arg8[%c112, %c0_31], %63 {strides = array<i32>} : memref<144x256xbf16, #tpu.memory_space<vmem>>, vector<16x256xbf16>,
    %c239_i32 = arith.constant 239 : i32
    %65 = tpu.dynamic_rotate %13 by %c239_i32 dim 1 : vector<16x256xf32>, i32 -> vector<16x256xf32>
    %c8 = arith.constant 8 : index
    %c0_32 = arith.constant 0 : index
    %c0_33 = arith.constant 0 : index
    %66 = vector.load %arg6[%c8, %c0_32, %c0_33] : memref<9x1x256xf32, #tpu.memory_space<vmem>>, vector<1x1x256xf32>
    %67 = vector.shape_cast %66 : vector<1x1x256xf32> to vector<1x256xf32>
    %68 = vector.broadcast %67 : vector<1x256xf32> to vector<16x256xf32>
    %69 = arith.mulf %65, %68 : vector<16x256xf32>
    %70 = arith.truncf %69 : vector<16x256xf32> to vector<16x256xbf16>
    %c128 = arith.constant 128 : index
    %c0_34 = arith.constant 0 : index
    %71 = vector.load %arg8[%c128, %c0_34] : memref<144x256xbf16, #tpu.memory_space<vmem>>, vector<16x256xbf16>
    tpu.vector_store %arg8[%c128, %c0_34], %70 {strides = array<i32>} : memref<144x256xbf16, #tpu.memory_space<vmem>>, vector<16x256xbf16>,
    %c0_35 = arith.constant 0 : index
    %c0_36 = arith.constant 0 : index
    %72 = vector.load %arg4[%c0_35, %c0_36] : memref<4x144xbf16, #tpu.memory_space<vmem>>, vector<4x144xbf16>
    %c0_37 = arith.constant 0 : index
    %c0_38 = arith.constant 0 : index
    %73 = vector.load %arg8[%c0_37, %c0_38] : memref<144x256xbf16, #tpu.memory_space<vmem>>, vector<144x256xbf16>
    %cst_39 = arith.constant dense<0.000000e+00> : vector<4x256xf32>
    %74 = tpu.matmul %72, %73, %cst_39 {dimension_numbers = #tpu.dot_dimension_numbers<[1], [0], [0], [1], [0, 0, 1, 1], [], []>} : vector<4x144xbf16>, vector<144x256xbf16>, vector<4x256xf32> -> vector<4x256xf32>
    %c0_40 = arith.constant 0 : index
    %c0_41 = arith.constant 0 : index
    %75 = vector.load %arg5[%c0_40, %c0_41] : memref<4x1xf32, #tpu.memory_space<vmem>>, vector<4x1xf32>
    %76 = vector.broadcast %75 : vector<4x1xf32> to vector<4x256xf32>
    %77 = arith.addf %74, %76 : vector<4x256xf32>
    %cst_42 = arith.constant 0.000000e+00 : f32
    %78 = vector.broadcast %cst_42 : f32 to vector<4x256xf32>
    %79 = arith.subf %78, %77 : vector<4x256xf32>
    %80 = math.exp %79 : vector<4x256xf32>
    %cst_43 = arith.constant 1.000000e+00 : f32
    %81 = vector.broadcast %cst_43 : f32 to vector<4x256xf32>
    %82 = arith.addf %81, %80 : vector<4x256xf32>
    %83 = tpu.reciprocal %82 {approx = true} : vector<4x256xf32> -> vector<4x256xf32>
    %84 = arith.mulf %77, %83 : vector<4x256xf32>
    %85 = arith.extf %1 : vector<4x256xbf16> to vector<4x256xf32>
    %86 = arith.addf %85, %84 : vector<4x256xf32>
    %87 = arith.truncf %86 : vector<4x256xf32> to vector<4x256xbf16>
    %c0_44 = arith.constant 0 : index
    %c0_45 = arith.constant 0 : index
    %c0_46 = arith.constant 0 : index
    %88 = vector.load %arg7[%c0_44, %c0_45, %c0_46] : memref<1x4x256xbf16, #tpu.memory_space<vmem>>, vector<1x4x256xbf16>
    %89 = vector.shape_cast %88 : vector<1x4x256xbf16> to vector<4x256xbf16>
    %90 = vector.shape_cast %87 : vector<4x256xbf16> to vector<1x4x256xbf16>
    tpu.vector_store %arg7[%c0_44, %c0_45, %c0_46], %90 {strides = array<i32>} : memref<1x4x256xbf16, #tpu.memory_space<vmem>>, vector<1x4x256xbf16>,
    return
  }
  func.func @transform_0(%arg0: i32) -> (i32, i32, i32) {
    %c0_i32 = arith.constant 0 : i32
    %c0_i32_0 = arith.constant 0 : i32
    %c0_i32_1 = arith.constant 0 : i32
    return %arg0, %c0_i32, %c0_i32_0 : i32, i32, i32
  }
  func.func @transform_1(%arg0: i32) -> (i32, i32) {
    %c0_i32 = arith.constant 0 : i32
    %c0_i32_0 = arith.constant 0 : i32
    %c0_i32_1 = arith.constant 0 : i32
    return %c0_i32, %c0_i32_0 : i32, i32
  }
  func.func @transform_2(%arg0: i32) -> (i32, i32) {
    %c0_i32 = arith.constant 0 : i32
    %c0_i32_0 = arith.constant 0 : i32
    %c0_i32_1 = arith.constant 0 : i32
    return %c0_i32, %c0_i32_0 : i32, i32
  }
  func.func @transform_3(%arg0: i32) -> (i32, i32) {
    %c0_i32 = arith.constant 0 : i32
    %c0_i32_0 = arith.constant 0 : i32
    %c0_i32_1 = arith.constant 0 : i32
    return %c0_i32, %c0_i32_0 : i32, i32
  }
  func.func @transform_4(%arg0: i32) -> (i32, i32) {
    %c0_i32 = arith.constant 0 : i32
    %c0_i32_0 = arith.constant 0 : i32
    %c0_i32_1 = arith.constant 0 : i32
    return %c0_i32, %c0_i32_0 : i32, i32
  }
  func.func @transform_5(%arg0: i32) -> (i32, i32, i32) {
    %c0_i32 = arith.constant 0 : i32
    %c0_i32_0 = arith.constant 0 : i32
    %c0_i32_1 = arith.constant 0 : i32
    %c0_i32_2 = arith.constant 0 : i32
    return %c0_i32, %c0_i32_0, %c0_i32_1 : i32, i32, i32
  }
  func.func @transform_6(%arg0: i32) -> (i32, i32, i32) {
    %c0_i32 = arith.constant 0 : i32
    %c0_i32_0 = arith.constant 0 : i32
    %c0_i32_1 = arith.constant 0 : i32
    return %arg0, %c0_i32, %c0_i32_0 : i32, i32, i32
  }
}

</mosaic_0001>

<bundles_post_ra>
// kernel: tpu_custom_call.1
= control target key start
LH: loop header
LB: loop body
LE: loop exit
PB: predicated region body
PF: predicated region fallthrough
CT: control target
= control target key end

     0   :  { %11 = vsyncpa [#allocation4], 0  ;;  %s1950_s0 = inlined_call_operand.hbm [shape: bf16[2,4,256], index: 0, kind: input, shape index: {}]   ;;  %s1951_s1 = inlined_call_operand.hbm [shape: bf16[16,4], index: 1, kind: input, shape index: {}]   ;;  %s1952_s2 = inlined_call_operand.hbm [shape: f32[16,1], index: 2, kind: input, shape index: {}]   ;;  %s1953_s3 = inlined_call_operand.hbm [shape: bf16[4,144], index: 3, kind: input, shape index: {}]   ;;  %s1954_s4 = inlined_call_operand.hbm [shape: f32[4,1], index: 4, kind: input, shape index: {}]   ;;  %s1955_s5 = inlined_call_operand.hbm [shape: f32[9,1,256], index: 5, kind: input, shape index: {}]   ;;  %s1956_s6 = inlined_call_operand.hbm [shape: bf16[2,4,256], index: 6, kind: output, shape index: {}]  }
   0x1   :  { %13 = vsyncpa [#allocation4 + $0x1], 0 }
   0x2   :  { %14 = vsyncpa [#allocation7], 0 }
   0x3   :  { %15 = vsyncpa [#allocation10], 0 }
   0x4   :  { %16 = vsyncpa [#allocation13], 0 }
   0x5   :  { %17 = vsyncpa [#allocation5], 0 }
   0x6   :  { %19 = vsyncpa [#allocation5 + $0x1], 0  ;;  %s1450_s21 = smov 0   ;;  %s1452_s22 = smov 0  }
   0x7   :  { %s1454_s23 = smov 0   ;;  %s1456_s24 = smov 0  }
   0x8 LB: > { %s1392_s25 = smov [#allocation6]   ;;  %s1471_s27 = sadd.s32 4294967295, %s1390_s24   ;;  %s1390_s24 = sphi %s1456_s24, %s1981_s24   ;;  %s1386_s23 = sphi %s1454_s23, %s1980_s23   ;;  %s1382_s22 = sphi %s1452_s22, %s1979_s22   ;;  %s1378_s21 = sphi %s1450_s21, %s1978_s21  }
   0x9   : > { %s199_s26 = sshll.u32 %s1392_s25, 4  ;;  %p971_p0 = scmp.ge.s32.totalorder %s1390_s24, 1  ;;  %s1476_s26 = int_to_ptr.vmem [resolvable:$true] %s199_s26 }
   0xa   : > { %p1957_p1 = scmp.eq.s32.totalorder %s1471_s27, 0  ;;  %p187_p2 = scmp.lt.s32.totalorder %s1390_s24, 3 }
   0xb   : > { %s1393_s29 = smov [#allocation9]   ;;  %s1394_s8 = smov [#allocation8]  }
   0xc   : > { %p1478_p3 = pnand %p971_p0, %p187_p2  ;;  %s226_s30 = sshll.u32 %s1393_s29, 4  ;;  %s1491_s30 = int_to_ptr.vmem [resolvable:$true] %s226_s30 }
   0xd   : > { %s212_s9 = sshll.u32 %s1394_s8, 4  ;;  %s1142_s12 = scalar_lea.hbm %s1951_s1, 128  ;;  %s1493_s9 = int_to_ptr.vmem [resolvable:$true] %s212_s9 }
   0xe   : > { %s1960_s28 = scalar_select %p1478_p3, 1, 0 }
   0xf   : > { %p1027_p5 = pneg %p1478_p3  ;;  %p1143_p7 = scmp.ne.s32.totalorder %s1951_s1, %s1142_s12 }
  0x10   : > { %p1149_p11 = scmp.lt.u32.totalorder %s1142_s12, %s1951_s1 }
  0x11   : > { %p1487_p6 = pnand %p1027_p5, %p1957_p1 }
  0x13   : > { %p1503_p8 = pneg %p1487_p6 }
  0x15   : > { %p1145_p9 = pnand %p1503_p8, %p1143_p7 }
  0x17   : > { %p1146_p10 = pneg %p1145_p9 }
  0x19   : > { %p1151_p12 = pnand %p1149_p11, %p1146_p10 }
  0x1b   : > { %1154 = shalt.err (!%p1151_p12)
}
  0x1c   : > { %s1155_s18 = scalar_lea.vmem %s1476_s26, 128  ;;  %p1163_p5 = scmp.lt.s32.totalorder %s1476_s26, %s1476_s26 }
  0x1d   : > { %p1156_p13 = scmp.ne.s32.totalorder %s1476_s26, %s1155_s18  ;;  %p1164_p4 = scmp.lt.s32.totalorder %s1155_s18, %s1155_s18 }
  0x1f   : > { %p1158_p0 = pnand %p1156_p13, %p1503_p8  ;;  %p1165_p7 = por %p1164_p4, %p1163_p5 }
  0x21   : > { %p1159_p2 = pneg %p1158_p0 }
  0x23   : > { %p1166_p9 = pnand %p1165_p7, %p1159_p2 }
  0x25   : > { %1169 = shalt.err (!%p1166_p9)
}
  0x26   : > { %s1395_s19 = smov 64   ;;  %s1396_s20 = smov 4  }
  0x27   : > { %1030 = dma.hbm_to_vmem [thread:$0]  (!%p1487_p6), %s1951_s1, 128, %s1476_s26, [#allocation7], %s1395_s19, %s1395_s19, %s1396_s20  }
  0x28   : > { %s1170_s11 = scalar_lea.hbm %s1953_s3, 64 }
  0x29   : > { %p1171_p4 = scmp.ne.s32.totalorder %s1953_s3, %s1170_s11  ;;  %p1177_p12 = scmp.lt.u32.totalorder %s1170_s11, %s1953_s3 }
  0x2b   : > { %p1173_p10 = pnand %p1171_p4, %p1503_p8 }
  0x2d   : > { %p1174_p11 = pneg %p1173_p10 }
  0x2f   : > { %p1179_p13 = pnand %p1177_p12, %p1174_p11 }
  0x31   : > { %1182 = shalt.err (!%p1179_p13)
}
  0x32   : > { %s1183_s26 = scalar_lea.vmem %s1491_s30, 64  ;;  %p1191_p7 = scmp.lt.s32.totalorder %s1491_s30, %s1491_s30 }
  0x33   : > { %p1184_p0 = scmp.ne.s32.totalorder %s1491_s30, %s1183_s26  ;;  %p1192_p9 = scmp.lt.s32.totalorder %s1183_s26, %s1183_s26 }
  0x35   : > { %p1186_p2 = pnand %p1184_p0, %p1503_p8  ;;  %p1193_p4 = por %p1192_p9, %p1191_p7 }
  0x37   : > { %p1187_p5 = pneg %p1186_p2 }
  0x39   : > { %p1194_p10 = pnand %p1193_p4, %p1187_p5 }
  0x3b   : > { %1197 = shalt.err (!%p1194_p10)
}
  0x3c   : > { %1036 = dma.hbm_to_vmem [thread:$0]  (!%p1487_p6), %s1953_s3, 64, %s1491_s30, [#allocation10]  }
  0x3d   : > { %s1198_s25 = scalar_lea.hbm %s1952_s2, 256 }
  0x3e   : > { %p1199_p11 = scmp.ne.s32.totalorder %s1952_s2, %s1198_s25  ;;  %p1205_p0 = scmp.lt.u32.totalorder %s1198_s25, %s1952_s2 }
  0x40   : > { %p1201_p12 = pnand %p1199_p11, %p1503_p8 }
  0x42   : > { %p1202_p13 = pneg %p1201_p12 }
  0x44   : > { %p1207_p2 = pnand %p1205_p0, %p1202_p13 }
  0x46   : > { %1210 = shalt.err (!%p1207_p2)
}
  0x47   : > { %s1211_s30 = scalar_lea.vmem %s1493_s9, 256  ;;  %p1219_p4 = scmp.lt.s32.totalorder %s1493_s9, %s1493_s9 }
  0x48   : > { %p1212_p5 = scmp.ne.s32.totalorder %s1493_s9, %s1211_s30  ;;  %p1220_p10 = scmp.lt.s32.totalorder %s1211_s30, %s1211_s30 }
  0x4a   : > { %p1214_p7 = pnand %p1212_p5, %p1503_p8  ;;  %p1221_p11 = por %p1220_p10, %p1219_p4 }
  0x4c   : > { %p1215_p9 = pneg %p1214_p7 }
  0x4e   : > { %p1222_p12 = pnand %p1221_p11, %p1215_p9 }
  0x50   : > { %1225 = shalt.err (!%p1222_p12)
}
  0x51   : > { %s1397_s12 = smov 128   ;;  %s1398_s13 = smov 8  }
  0x52   : > { %1033 = dma.hbm_to_vmem [thread:$0]  (!%p1487_p6), %s1952_s2, 256, %s1493_s9, [#allocation7], %s1397_s12, %s1397_s12, %s1398_s13  }
  0x53   : > { %s1399_s26 = smov [#allocation11]   ;;  %s1400_s18 = smov [#allocation12]  }
  0x54   : > { %s237_s17 = sshll.u32 %s1399_s26, 4  ;;  %s247_s19 = sshll.u32 %s1400_s18, 4  ;;  %s238_s17 = int_to_ptr.vmem [resolvable:$true] %s237_s17  ;;  %s248_s19 = int_to_ptr.vmem [resolvable:$true] %s247_s19 }
  0x55   : > { %s1226_s29 = scalar_lea.hbm %s1954_s4, 64 }
  0x56   : > { %p1227_p13 = scmp.ne.s32.totalorder %s1954_s4, %s1226_s29  ;;  %p1233_p5 = scmp.lt.u32.totalorder %s1226_s29, %s1954_s4 }
  0x58   : > { %p1229_p0 = pnand %p1227_p13, %p1503_p8 }
  0x5a   : > { %p1230_p2 = pneg %p1229_p0 }
  0x5c   : > { %p1235_p7 = pnand %p1233_p5, %p1230_p2 }
  0x5e   : > { %1238 = shalt.err (!%p1235_p7)
}
  0x5f   : > { %s1239_s9 = scalar_lea.vmem %s238_s17, 64  ;;  %p1247_p11 = scmp.lt.s32.totalorder %s238_s17, %s238_s17 }
  0x60   : > { %p1240_p9 = scmp.ne.s32.totalorder %s238_s17, %s1239_s9  ;;  %p1248_p12 = scmp.lt.s32.totalorder %s1239_s9, %s1239_s9 }
  0x62   : > { %p1242_p4 = pnand %p1240_p9, %p1503_p8  ;;  %p1249_p1 = por %p1248_p12, %p1247_p11 }
  0x64   : > { %p1243_p10 = pneg %p1242_p4 }
  0x66   : > { %p1250_p3 = pnand %p1249_p1, %p1243_p10 }
  0x68   : > { %1253 = shalt.err (!%p1250_p3)
}
  0x69   : > { %1039 = dma.hbm_to_vmem [thread:$0]  (!%p1487_p6), %s1954_s4, 64, %s238_s17, [#allocation10]  }
  0x6a   : > { %s1254_s26 = scalar_lea.hbm %s1955_s5, 288 }
  0x6b   : > { %p1255_p13 = scmp.ne.s32.totalorder %s1955_s5, %s1254_s26  ;;  %p1261_p3 = scmp.lt.u32.totalorder %s1254_s26, %s1955_s5 }
  0x6d   : > { %p1257_p0 = pnand %p1255_p13, %p1503_p8 }
  0x6f   : > { %p1258_p1 = pneg %p1257_p0 }
  0x71   : > { %p1263_p2 = pnand %p1261_p3, %p1258_p1 }
  0x73   : > { %1266 = shalt.err (!%p1263_p2)
}
  0x74   : > { %s1267_s8 = scalar_lea.vmem %s248_s19, 288  ;;  %p1275_p4 = scmp.lt.s32.totalorder %s248_s19, %s248_s19 }
  0x75   : > { %p1268_p5 = scmp.ne.s32.totalorder %s248_s19, %s1267_s8  ;;  %p1276_p10 = scmp.lt.s32.totalorder %s1267_s8, %s1267_s8 }
  0x77   : > { %p1270_p7 = pnand %p1268_p5, %p1503_p8  ;;  %p1277_p11 = por %p1276_p10, %p1275_p4 }
  0x79   : > { %p1271_p9 = pneg %p1270_p7 }
  0x7b   : > { %p1278_p12 = pnand %p1277_p11, %p1271_p9 }
  0x7d   : > { %1281 = shalt.err (!%p1278_p12)
}
  0x7e   : > { %s1401_s17 = smov 32   ;;  %s1402_s15 = smov 2  }
  0x7f   : > { %1042 = dma.hbm_to_vmem [thread:$0]  (!%p1487_p6), %s1955_s5, 288, %s248_s19, [#allocation13], %s1401_s17, %s1401_s17, %s1402_s15  }
  0x80   : > { %s970_s30 = sadd.s32 4294967294, %s1390_s24   ;;  %s1608_s9 = sadd.s32 1, %s1390_s24  }
  0x81   : > { %s32_s12 = sadd.s32 1, %s1386_s23  ;;  %s29_s13 = ssub.s32 %s1390_s24, %s1608_s9 }
  0x82   : > { %p39_p8 = scmp.ne.s32.totalorder %s1386_s23, %s1382_s22  ;;  %p30_p13 = scmp.eq.s32.totalorder %s29_s13, 0 }
  0x83   : > { %p40_p0 = scmp.eq.s32.totalorder %s1390_s24, 0  ;;  %p45_p1 = scmp.ne.s32.totalorder %s1382_s22, %s1378_s21 }
  0x84   : > { %p174_p3 = scmp.eq.s32.totalorder %s1471_s27, 1  ;;  %p1963_p5 = scmp.eq.s32.totalorder %s1471_s27, 0 }
  0x85   : > { %s1620_s14 = scalar_select %p30_p13, %s1386_s23, %s32_s12  }
  0x86   : > { %p41_p2 = por %p40_p0, %p39_p8  ;;  %p1624_p7 = por %p1963_p5, %p45_p1 }
  0x87   : > { %p1628_p6 = por %p174_p3, %p39_p8  ;;  %p180_p9 = scmp.eq.s32.totalorder %s970_s30, 1 }
  0x88   : > { %p1056_p4 = scmp.lt.s32.totalorder %s1390_s24, 2  ;;  %s261_s16 = sand.u32 1, %s1386_s23  }
  0x89   : > { %s1965_s19 = scalar_select %p1628_p6, 1, 0 }
  0x8a   : > { %p1634_p10 = por %p180_p9, %p45_p1  ;;  %s978_s18 = sshll.u32 %s261_s16, 2 }
  0x8b   : > { %s1001_s20 = sshll.u32 %s1390_s24, 6  ;;  %s265_s17 = scalar_lea.vmem [#allocation3], %s978_s18 }
  0x8c   : > { %s1966_s26 = scalar_select %p1634_p10, 1, 0 }
  0x8d   : > { %s1642_s8 = scalar_lea.hbm %s1950_s0, %s1001_s20  ;;  %s273_s15 = sshll.u32 %s265_s17, 4  ;;  %s1648_s15 = int_to_ptr.vmem [resolvable:$true] %s273_s15 }
  0x8e   : > { %p1644_p11 = pnand %p1056_p4, %p41_p2  ;;  %s262_s11 = scalar_lea.sflag [#allocation4], %s261_s16 }
  0x8f   : > { %s1282_s30 = scalar_lea.hbm %s1642_s8, 64  ;;  %s1287_s18 = scalar_lea.hbm %s1950_s0, 128 }
  0x90   : > { %p1283_p12 = scmp.ne.s32.totalorder %s1642_s8, %s1282_s30  ;;  %p1284_p8 = pneg %p1644_p11 }
  0x91   : > { %p1288_p1 = scmp.lt.u32.totalorder %s1642_s8, %s1950_s0  ;;  %p1289_p3 = scmp.lt.u32.totalorder %s1287_s18, %s1282_s30 }
  0x92   : > { %p1285_p13 = pnand %p1284_p8, %p1283_p12  ;;  %p1291_p5 = scmp.lt.u32.totalorder %s1282_s30, %s1642_s8 }
  0x93   : > { %p1290_p2 = por %p1289_p3, %p1288_p1 }
  0x94   : > { %p1286_p0 = pneg %p1285_p13 }
  0x95   : > { %p1292_p9 = por %p1291_p5, %p1290_p2 }
  0x97   : > { %p1293_p4 = pnand %p1292_p9, %p1286_p0 }
  0x99   : > { %1296 = shalt.err (!%p1293_p4)
}
  0x9a   : > { %s1297_s16 = scalar_lea.vmem %s1648_s15, 64  ;;  %s1403_s29 = smov [#allocation3]  }
  0x9b   : > { %p1298_p12 = scmp.ne.s32.totalorder %s1648_s15, %s1297_s16  ;;  %s1302_s17 = sshll.u32 %s1403_s29, 4  ;;  %s1303_s17 = int_to_ptr.vmem [resolvable:$false] %s1302_s17 }
  0x9c   : > { %s1304_s12 = scalar_lea.vmem %s1303_s17, 128  ;;  %p1305_p6 = scmp.lt.s32.totalorder %s1648_s15, %s1303_s17 }
  0x9d   : > { %p1300_p13 = pnand %p1298_p12, %p1284_p8  ;;  %p1306_p1 = scmp.lt.s32.totalorder %s1304_s12, %s1297_s16 }
  0x9f   : > { %p1301_p10 = pneg %p1300_p13  ;;  %p1307_p3 = por %p1306_p1, %p1305_p6 }
  0xa1   : > { %p1308_p2 = pnand %p1307_p3, %p1301_p10 }
  0xa3   : > { %1311 = shalt.err (!%p1308_p2)
}
  0xa4   : > { %1046 = dma.hbm_to_vmem [thread:$0]  (!%p1644_p11), %s1642_s8, 64, %s1648_s15, %s262_s11  }
  0xa5   : > { %p1968_p0 = scmp.ne.s32.totalorder %s1960_s28, 0 }
  0xa6   : > { %s1678_s30 = sand.u32 (!%p1968_p0), 1, %s1382_s22  }
  0xa7   : > { %282 = sbr.rel (%p1968_p0) target bundleno = 898 (0x382), region = 44  ;;  %s982_s13 = sshll.u32 (!%p1968_p0), %s1678_s30, 2 }
  0xa8   : > { %s285_s18 = scalar_lea.sflag (!%p1968_p0), [#allocation4], %s1678_s30  ;;  %s288_s20 = scalar_lea.vmem (!%p1968_p0), [#allocation3], %s982_s13 }
  0xae   : > { %1357 = dma.done.wait (%p1624_p7), %s285_s18, 64  }
  0xaf   : > { %1359 = vsyncadd (%p1624_p7), %s285_s18, 4294967232  ;;  %p1969_p6 = scmp.eq.s32.totalorder %s1471_s27, 0 }
  0xb1   : > { %1361 = dma.done.wait (%p1969_p6), [#allocation7], 384   ;;  %p1970_p10 = pmov %p1969_p6 }
  0xb2   : > { %p1971_p11 = pmov %p1969_p6 }
  0xb3   : > { %1363 = vsyncadd (%p1970_p10), [#allocation7], 4294966912 }
  0xb4   : > { %1365 = dma.done.wait (%p1971_p11), [#allocation10], 128   ;;  %p1972_p8 = pmov %p1969_p6 }
  0xb5   : > { %p1973_p5 = pmov %p1969_p6 }
  0xb6   : > { %1367 = vsyncadd (%p1972_p8), [#allocation10], 4294967168 }
  0xb7   : > { %1369 = dma.done.wait (%p1973_p5), [#allocation13], 288   ;;  %p1974_p9 = pmov %p1973_p5 }
  0xb8   : > { %v362_v0 = vlaneseq  ;;  %v1404_v1 = vmov 1983009808   ;;  %v1405_v3 = vmov 0   ;;  %vm371_vm0 = vcmask 1041408   ;;  %v1704_v7 = vld [vmem:[%s288_s20] sm:$0xf] }
  0xb9   : > { %1371 = vsyncadd (%p1974_p9), [#allocation13], 4294967008  ;;  %v360_v2 = vunpack.c.l.s4 %v1404_v1  ;;  %410 = vmatprep.mubr.bf16.mxu0 %v1405_v3  ;;  %1116 = vset.pattern.permute.xlu0 %v1405_v3  ;;  %v341_v9 = vld [vmem:[#allocation8] sm:$0xff]  ;;  %v342_v12 = vld [vmem:[#allocation8 + $0x8] sm:$0xff]  ;;  %vm367_vm1 = vcmask 31744   ;;  %s1406_s28 = smov 16  }
  0xba   : > { %v1701_v4 = vshrl.u32 %v362_v0, 7  ;;  %345 = vperm.xlu0 %1116, %v341_v9   ;;  %v1117_v13 = vld [vmem:[#allocation6] sm:$0xff]   ;;  %s1407_s7 = smov 17   ;;  %s1408_s8 = smov 15   ;;  %v741_v51 = vld [vmem:[#allocation11] sm:$0xf] }
  0xbb   : > { %v361_v5 = vunpack.c.0.s8 %v360_v2  ;;  %s1409_s15 = smov 1   ;;  %s1410_s10 = smov 127   ;;  %v1753_v50 = vld.sshfl [vmem:[#allocation9] sm:$0x33 pattern:$0x76325410] }
  0xbc   : > { %s1411_s11 = smov 113   ;;  %s1412_s25 = smov 112   ;;  %v755_v52 = vcombine.high %v1753_v50, %v1753_v50  ;;  %vm757_vm2 = vcmask 130048   ;;  %v1768_v63 = vand.u32 127, %v362_v0  ;;  %v1771_v1 = vsub.s32 0, %v1701_v4 }
  0xbd   : > { %v364_v6 = vsub.s32 %v361_v5, %v1701_v4  ;;  %s1413_s16 = smov 111   ;;  %v1774_v2 = vsub.s32 1, %v1701_v4  ;;  %v460_v3 = vld [vmem:[#allocation12] sm:$0x3]  ;;  %s1002_s29 = sshll.u32 %s1471_s27, 6 }
  0xbe   : > { %350 = vperm.xlu0 %1116, %v342_v12   ;;  %993 = vmatprep.mubr.msk.bf16.mxu1 %vm757_vm2, %v755_v52  ;;  %vm455_vm3 = vcmp.lt.s32.totalorder %v1768_v63, 17  ;;  %vm488_vm4 = vcmp.lt.s32.totalorder %v1768_v63, 16  ;;  %vm522_vm5 = vcmp.lt.s32.totalorder %v1768_v63, 15  ;;  %vm556_vm6 = vcmp.lt.s32.totalorder %v1768_v63, 1  ;;  %s336_s17 = scalar_lea.vmem [#allocation14], %s982_s13  ;;  %p1975_p4 = scmp.ne.s32.totalorder %s1965_s19, 0 }
  0xbf   : > { %v365_v8 = vrot.slane %v1704_v7, %v364_v6  ;;  %v469_v9 = vrot.slane %v460_v3, %v1774_v2  ;;  %vm594_vm7 = vcmp.lt.s32.totalorder %v1768_v63, 127  ;;  %vm628_vm8 = vcmp.lt.s32.totalorder %v1768_v63, 113  ;;  %s852_s12 = sshll.u32 %s336_s17, 4  ;;  %s1414_s27 = smov [#allocation14]   ;;  %s1908_s12 = int_to_ptr.vmem [resolvable:$true] %s852_s12 }
  0xc0   : > { %vm662_vm9 = vcmp.lt.s32.totalorder %v1768_v63, 112  ;;  %vm696_vm10 = vcmp.lt.s32.totalorder %v1768_v63, 111  ;;  %s1316_s13 = sshll.u32 %s1414_s27, 4  ;;  %s1317_s13 = int_to_ptr.vmem [resolvable:$false] %s1316_s13 }
  0xc1   : > { %v366_v10 = vcombine.high %v365_v8, %v365_v8  ;;  %v373_v11 = vsel %vm371_vm0, %v365_v8, 0  ;;  %v465_v8 = vrot.slane %v460_v3, %v1771_v1  ;;  %p1319_p1 = scmp.lt.s32.totalorder %s1908_s12, %s1317_s13 }
  0xc3   : > { %990 = vmatprep.subr.msk.bf16.mxu0 %vm371_vm0, %v366_v10  ;;  %v494_v10 = vld [vmem:[#allocation12 + $0x2] sm:$0x3] }
  0xc4   : > { %379 = vmatpush1.bf16.msra.mxu0 %v373_v11 }
  0xc7   : > { %991 = vmatmul.mubr.msk.bf16.vlgmr.msra.gmra.mrb[0].mxu0 %vm367_vm1, %v1117_v13 }
 0x139   : > { %v346_v14 = vpop.permute.xlu0 %345 }
 0x13d   : > { %v351_v18 = vpop.permute.xlu0 %350 }
 0x19a   : > { %v412_v15 = vpop.f32.mrb[0].mxu0 }
 0x19b   : > { %v413_v16 = vadd.f32 %v412_v15, %v346_v14  ;;  %v414_v17 = vpop.f32.mrb[1].mxu0  ;;  %v503_v15 = vrot.slane %v494_v10, %v1774_v2 }
 0x19c   : > { %v415_v19 = vadd.f32 %v414_v17, %v346_v14  ;;  %v416_v20 = vpop.f32.mrb[2].mxu0  ;;  %v499_v14 = vrot.slane %v494_v10, %v1771_v1  ;;  %v528_v17 = vld [vmem:[#allocation12 + $0x4] sm:$0x3] }
 0x19d   : > { %v421_v21 = vsub.f32 0.0, %v413_v16  ;;  %v417_v22 = vadd.f32 %v416_v20, %v351_v18  ;;  %v418_v23 = vpop.f32.mrb[3].mxu0 }
 0x19e   : > { %v422_v24 = vsub.f32 0.0, %v415_v19  ;;  %v419_v25 = vadd.f32 %v418_v23, %v351_v18 }
 0x19f   : > { %v425_v26 = vmul.f32 1.442695, %v421_v21  ;;  %v423_v27 = vsub.f32 0.0, %v417_v22 }
 0x1a0   : > { %v427_v28 = vmul.f32 1.442695, %v422_v24  ;;  %v424_v29 = vsub.f32 0.0, %v419_v25 }
 0x1a1   : > { %1118 = vpow2.f32 %v425_v26  ;;  %v429_v30 = vmul.f32 1.442695, %v423_v27  ;;  %v537_v26 = vrot.slane %v528_v17, %v1774_v2 }
 0x1a2   : > { %1120 = vpow2.f32 %v427_v28  ;;  %v431_v31 = vmul.f32 1.442695, %v424_v29 }
 0x1a3   : > { %1122 = vpow2.f32 %v429_v30 }
 0x1a4   : > { %1124 = vpow2.f32 %v431_v31 }
 0x1ab   : > { %v1119_v32 = vpop.eup %1118 }
 0x1ac   : > { %v1121_v33 = vpop.eup %1120  ;;  %v433_v34 = vadd.f32 1.0, %v1119_v32 }
 0x1ad   : > { %v1123_v35 = vpop.eup %1122  ;;  %v434_v36 = vadd.f32 1.0, %v1121_v33 }
 0x1ae   : > { %v1125_v37 = vpop.eup %1124  ;;  %1126 = vrcp.f32 %v433_v34  ;;  %v435_v38 = vadd.f32 1.0, %v1123_v35 }
 0x1af   : > { %1128 = vrcp.f32 %v434_v36  ;;  %v436_v39 = vadd.f32 1.0, %v1125_v37 }
 0x1b0   : > { %1130 = vrcp.f32 %v435_v38 }
 0x1b1   : > { %1132 = vrcp.f32 %v436_v39 }
 0x1b8   : > { %v1127_v40 = vpop.eup %1126 }
 0x1b9   : > { %v1129_v41 = vpop.eup %1128  ;;  %v1707_v42 = vmul.f32 %v1127_v40, %v413_v16 }
 0x1ba   : > { %v1131_v43 = vpop.eup %1130  ;;  %v1714_v46 = vmul.f32 %v1129_v41, %v415_v19 }
 0x1bb   : > { %v1133_v44 = vpop.eup %1132  ;;  %v1709_v45 = vmul.f32 %v1131_v43, %v417_v22  ;;  %480 = vrot.lane.b32.xlu0 %v1707_v42, %s1406_s28  ;;  %445 = vrot.lane.b32.xlu1 %v1707_v42, %s1407_s7  ;;  %v562_v22 = vld [vmem:[#allocation12 + $0x6] sm:$0x3] }
 0x1bc   : > { %v1716_v47 = vmul.f32 %v1133_v44, %v419_v25  ;;  %v533_v25 = vrot.slane %v528_v17, %v1771_v1  ;;  %v567_v29 = vrot.slane %v562_v22, %v1771_v1  ;;  %v571_v30 = vrot.slane %v562_v22, %v1774_v2 }
 0x1bd   : > { %v582_v48 = vpack.c.bf16 %v1709_v45, %v1707_v42 }
 0x1be   : > { %v583_v49 = vpack.c.bf16 %v1716_v47, %v1714_v46 }
 0x1bf   : > { %514 = vrot.lane.b32.xlu0 %v1707_v42, %s1408_s8  ;;  %447 = vrot.lane.b32.xlu1 %v1709_v45, %s1407_s7 }
 0x1c3   : > { %548 = vrot.lane.b32.xlu0 %v1707_v42, %s1409_s15  ;;  %482 = vrot.lane.b32.xlu1 %v1709_v45, %s1406_s28 }
 0x1c7   : > { %586 = vrot.lane.b32.xlu0 %v1707_v42, %s1410_s10  ;;  %516 = vrot.lane.b32.xlu1 %v1709_v45, %s1408_s8 }
 0x1cb   : > { %620 = vrot.lane.b32.xlu0 %v1707_v42, %s1411_s11  ;;  %550 = vrot.lane.b32.xlu1 %v1709_v45, %s1409_s15 }
 0x1cf   : > { %654 = vrot.lane.b32.xlu0 %v1707_v42, %s1412_s25  ;;  %588 = vrot.lane.b32.xlu1 %v1709_v45, %s1410_s10 }
 0x1d3   : > { %449 = vrot.lane.b32.xlu0 %v1714_v46, %s1407_s7  ;;  %622 = vrot.lane.b32.xlu1 %v1709_v45, %s1411_s11 }
 0x1d7   : > { %484 = vrot.lane.b32.xlu0 %v1714_v46, %s1406_s28  ;;  %656 = vrot.lane.b32.xlu1 %v1709_v45, %s1412_s25 }
 0x1db   : > { %518 = vrot.lane.b32.xlu0 %v1714_v46, %s1408_s8  ;;  %451 = vrot.lane.b32.xlu1 %v1716_v47, %s1407_s7  ;;  %s838_s7 = scalar_lea.sflag [#allocation5], %s1678_s30 }
 0x1df   : > { %552 = vrot.lane.b32.xlu0 %v1714_v46, %s1409_s15  ;;  %486 = vrot.lane.b32.xlu1 %v1716_v47, %s1406_s28  ;;  %s1906_s28 = scalar_lea.hbm %s1956_s6, %s1002_s29 }
 0x1e3   : > { %688 = vrot.lane.b32.xlu0 %v1707_v42, %s1413_s16  ;;  %520 = vrot.lane.b32.xlu1 %v1716_v47, %s1408_s8  ;;  %s1312_s8 = scalar_lea.vmem %s1908_s12, 64 }
 0x1e4   : > { %p1313_p7 = scmp.ne.s32.totalorder %s1908_s12, %s1312_s8 }
 0x1e6   : > { %p1314_p12 = pnand %p1313_p7, %p1975_p4 }
 0x1e7   : > { %590 = vrot.lane.b32.xlu0 %v1714_v46, %s1410_s10  ;;  %554 = vrot.lane.b32.xlu1 %v1716_v47, %s1409_s15  ;;  %s1318_s15 = scalar_lea.vmem %s1317_s13, 128 }
 0x1e8   : > { %p1315_p13 = pneg %p1314_p12  ;;  %p1320_p3 = scmp.lt.s32.totalorder %s1318_s15, %s1312_s8 }
 0x1ea   : > { %p1321_p2 = por %p1320_p3, %p1319_p1 }
 0x1eb   : > { %624 = vrot.lane.b32.xlu0 %v1714_v46, %s1411_s11  ;;  %690 = vrot.lane.b32.xlu1 %v1709_v45, %s1413_s16 }
 0x1ec   : > { %p1322_p0 = pnand %p1321_p2, %p1315_p13 }
 0x1ef   : > { %658 = vrot.lane.b32.xlu0 %v1714_v46, %s1412_s25  ;;  %592 = vrot.lane.b32.xlu1 %v1716_v47, %s1410_s10 }
 0x1f3   : > { %692 = vrot.lane.b32.xlu0 %v1714_v46, %s1413_s16  ;;  %626 = vrot.lane.b32.xlu1 %v1716_v47, %s1411_s11 }
 0x1f7   : > { %744 = vperm.xlu0 %1116, %v741_v51   ;;  %660 = vrot.lane.b32.xlu1 %v1716_v47, %s1412_s25 }
 0x1fb   : > { %694 = vrot.lane.b32.xlu1 %v1716_v47, %s1413_s16 }
 0x22d   : > { %v481_v53 = vpop.permute.xlu0 %480  ;;  %v446_v54 = vpop.permute.xlu1 %445 }
 0x231   : > { %v515_v55 = vpop.permute.xlu0 %514  ;;  %v448_v56 = vpop.permute.xlu1 %447 }
 0x235   : > { %v549_v57 = vpop.permute.xlu0 %548  ;;  %v483_v58 = vpop.permute.xlu1 %482 }
 0x239   : > { %v1759_v59 = vpop.permute.xlu0 %586  ;;  %v1761_v60 = vpop.permute.xlu1 %516 }
 0x23d   : > { %v1763_v61 = vpop.permute.xlu0 %620  ;;  %v1765_v62 = vpop.permute.xlu1 %550 }
 0x241   : > { %v1776_v5 = vpop.permute.xlu0 %654  ;;  %v1778_v6 = vpop.permute.xlu1 %588 }
 0x245   : > { %v450_v0 = vpop.permute.xlu0 %449  ;;  %v1783_v11 = vpop.permute.xlu1 %622 }
 0x246   : > { %v456_v12 = vsel %vm455_vm3, %v446_v54, %v450_v0  ;;  %v458_v4 = vsel %vm455_vm3, %v450_v0, %v446_v54 }
 0x247   : > { %v472_v13 = vmul.f32 %v465_v8, %v458_v4  ;;  %v473_v16 = vmul.f32 %v469_v9, %v456_v12  ;;  %v634_v4 = vld [vmem:[#allocation12 + $0xc] sm:$0x3] }
 0x248   : > { %v639_v22 = vrot.slane %v634_v4, %v1771_v1 }
 0x249   : > { %v485_v18 = vpop.permute.xlu0 %484  ;;  %v1792_v19 = vpop.permute.xlu1 %656 }
 0x24a   : > { %v489_v20 = vsel %vm488_vm4, %v481_v53, %v485_v18  ;;  %v491_v21 = vsel %vm488_vm4, %v485_v18, %v481_v53 }
 0x24b   : > { %v506_v23 = vmul.f32 %v499_v14, %v491_v21  ;;  %v507_v24 = vmul.f32 %v503_v15, %v489_v20 }
 0x24d   : > { %v519_v27 = vpop.permute.xlu0 %518  ;;  %v452_v28 = vpop.permute.xlu1 %451 }
 0x24e   : > { %v523_v31 = vsel %vm522_vm5, %v515_v55, %v519_v27  ;;  %v525_v32 = vsel %vm522_vm5, %v519_v27, %v515_v55  ;;  %v457_v33 = vsel %vm455_vm3, %v448_v56, %v452_v28  ;;  %v459_v34 = vsel %vm455_vm3, %v452_v28, %v448_v56 }
 0x24f   : > { %v540_v35 = vmul.f32 %v533_v25, %v525_v32  ;;  %v541_v36 = vmul.f32 %v537_v26, %v523_v31  ;;  %v474_v37 = vmul.f32 %v465_v8, %v459_v34  ;;  %v475_v38 = vmul.f32 %v469_v9, %v457_v33  ;;  %v600_v8 = vld [vmem:[#allocation12 + $0xa] sm:$0x3]  ;;  %v668_v33 = vld [vmem:[#allocation12 + $0xe] sm:$0x3] }
 0x251   : > { %v553_v39 = vpop.permute.xlu0 %552  ;;  %v487_v40 = vpop.permute.xlu1 %486  ;;  %v477_v41 = vpack.c.bf16 %v475_v38, %v473_v16  ;;  %v476_v43 = vpack.c.bf16 %v474_v37, %v472_v13  ;;  %v609_v16 = vrot.slane %v600_v8, %v1774_v2 }
 0x252   : > { %v557_v44 = vsel %vm556_vm6, %v549_v57, %v553_v39  ;;  %v559_v51 = vsel %vm556_vm6, %v553_v39, %v549_v57  ;;  %v490_v52 = vsel %vm488_vm4, %v483_v58, %v487_v40  ;;  %v492_v53 = vsel %vm488_vm4, %v487_v40, %v483_v58 }
 0x253   : > { %v574_v54 = vmul.f32 %v567_v29, %v559_v51  ;;  %v575_v55 = vmul.f32 %v571_v30, %v557_v44  ;;  %v508_v56 = vmul.f32 %v499_v14, %v492_v53  ;;  %v509_v3 = vmul.f32 %v503_v15, %v490_v52  ;;  %761 = vmatprep.subr.bf16.mxu1 %v477_v41 }
 0x254   : > { %762 = vmatpush1.bf16.msra.mxu1 %v476_v43  ;;  %v605_v15 = vrot.slane %v600_v8, %v1771_v1  ;;  %v673_v39 = vrot.slane %v668_v33, %v1771_v1  ;;  %v677_v40 = vrot.slane %v668_v33, %v1774_v2 }
 0x255   : > { %v1820_v9 = vpop.permute.xlu0 %688  ;;  %v521_v10 = vpop.permute.xlu1 %520  ;;  %v511_v0 = vpack.c.bf16 %v509_v3, %v507_v24  ;;  %v510_v12 = vpack.c.bf16 %v508_v56, %v506_v23 }
 0x256   : > { %v524_v57 = vsel %vm522_vm5, %v1761_v60, %v521_v10  ;;  %v526_v58 = vsel %vm522_vm5, %v521_v10, %v1761_v60  ;;  %v643_v60 = vrot.slane %v634_v4, %v1774_v2 }
 0x257   : > { %v542_v13 = vmul.f32 %v533_v25, %v526_v58  ;;  %v543_v14 = vmul.f32 %v537_v26, %v524_v57  ;;  %763 = vmatprep.subr.bf16.mxu1 %v511_v0 }
 0x258   : > { %764 = vmatpush1.bf16.msra.mxu1 %v510_v12 }
 0x259   : > { %v591_v17 = vpop.permute.xlu0 %590  ;;  %v555_v18 = vpop.permute.xlu1 %554  ;;  %v545_v20 = vpack.c.bf16 %v543_v14, %v541_v36  ;;  %v544_v21 = vpack.c.bf16 %v542_v13, %v540_v35 }
 0x25a   : > { %v595_v23 = vsel %vm594_vm7, %v1759_v59, %v591_v17  ;;  %v597_v24 = vsel %vm594_vm7, %v591_v17, %v1759_v59  ;;  %v558_v25 = vsel %vm556_vm6, %v1765_v62, %v555_v18  ;;  %v560_v26 = vsel %vm556_vm6, %v555_v18, %v1765_v62  ;;  %v702_v62 = vld [vmem:[#allocation12 + $0x10] sm:$0x3] }
 0x25b   : > { %v612_v27 = vmul.f32 %v605_v15, %v595_v23  ;;  %v613_v28 = vmul.f32 %v609_v16, %v597_v24  ;;  %v576_v31 = vmul.f32 %v567_v29, %v560_v26  ;;  %v577_v32 = vmul.f32 %v571_v30, %v558_v25  ;;  %765 = vmatprep.subr.bf16.mxu1 %v545_v20 }
 0x25c   : > { %766 = vmatpush1.bf16.msra.mxu1 %v544_v21  ;;  %v711_v44 = vrot.slane %v702_v62, %v1774_v2 }
 0x25d   : > { %v625_v34 = vpop.permute.xlu0 %624  ;;  %v691_v35 = vpop.permute.xlu1 %690  ;;  %v579_v36 = vpack.c.bf16 %v577_v32, %v575_v55  ;;  %v578_v37 = vpack.c.bf16 %v576_v31, %v574_v54 }
 0x25e   : > { %v629_v59 = vsel %vm628_vm8, %v1763_v61, %v625_v34  ;;  %v631_v38 = vsel %vm628_vm8, %v625_v34, %v1763_v61  ;;  %v707_v61 = vrot.slane %v702_v62, %v1771_v1  ;;  %v814_v62 = vunpack.c.l.bf16 %v1704_v7 }
 0x25f   : > { %v646_v29 = vmul.f32 %v639_v22, %v629_v59  ;;  %v647_v30 = vmul.f32 %v643_v60, %v631_v38  ;;  %767 = vmatprep.subr.bf16.mxu1 %v579_v36 }
 0x260   : > { %768 = vmatpush1.bf16.msra.mxu1 %v578_v37 }
 0x261   : > { %v659_v41 = vpop.permute.xlu0 %658  ;;  %769 = vmatprep.subr.bf16.mxu1 %v583_v49  ;;  %v593_v43 = vpop.permute.xlu1 %592 }
 0x262   : > { %v663_v51 = vsel %vm662_vm9, %v1776_v5, %v659_v41  ;;  %v665_v52 = vsel %vm662_vm9, %v659_v41, %v1776_v5  ;;  %v596_v46 = vsel %vm594_vm7, %v1778_v6, %v593_v43  ;;  %v598_v47 = vsel %vm594_vm7, %v593_v43, %v1778_v6 }
 0x263   : > { %v680_v49 = vmul.f32 %v673_v39, %v663_v51  ;;  %v681_v1 = vmul.f32 %v677_v40, %v665_v52  ;;  %v614_v53 = vmul.f32 %v605_v15, %v596_v46  ;;  %v615_v2 = vmul.f32 %v609_v16, %v598_v47 }
 0x264   : > { %770 = vmatpush1.bf16.msra.mxu1 %v582_v48 }
 0x265   : > { %v693_v54 = vpop.permute.xlu0 %692  ;;  %v627_v55 = vpop.permute.xlu1 %626  ;;  %v617_v56 = vpack.c.bf16 %v615_v2, %v613_v28  ;;  %v616_v5 = vpack.c.bf16 %v614_v53, %v612_v27 }
 0x266   : > { %v697_v3 = vsel %vm696_vm10, %v1820_v9, %v693_v54  ;;  %v699_v6 = vsel %vm696_vm10, %v693_v54, %v1820_v9  ;;  %v630_v8 = vsel %vm628_vm8, %v1783_v11, %v627_v55  ;;  %v632_v42 = vsel %vm628_vm8, %v627_v55, %v1783_v11 }
 0x267   : > { %v714_v45 = vmul.f32 %v707_v61, %v697_v3  ;;  %v715_v48 = vmul.f32 %v711_v44, %v699_v6  ;;  %v648_v10 = vmul.f32 %v639_v22, %v630_v8  ;;  %v649_v0 = vmul.f32 %v643_v60, %v632_v42  ;;  %771 = vmatprep.subr.bf16.mxu1 %v617_v56 }
 0x268   : > { %772 = vmatpush1.bf16.msra.mxu1 %v616_v5 }
 0x269   : > { %v661_v12 = vpop.permute.xlu1 %660  ;;  %v651_v57 = vpack.c.bf16 %v649_v0, %v647_v30  ;;  %v650_v58 = vpack.c.bf16 %v648_v10, %v646_v29 }
 0x26a   : > { %v664_v9 = vsel %vm662_vm9, %v1792_v19, %v661_v12  ;;  %v666_v4 = vsel %vm662_vm9, %v661_v12, %v1792_v19 }
 0x26b   : > { %v682_v13 = vmul.f32 %v673_v39, %v664_v9  ;;  %v683_v14 = vmul.f32 %v677_v40, %v666_v4  ;;  %773 = vmatprep.subr.bf16.mxu1 %v651_v57 }
 0x26c   : > { %774 = vmatpush1.bf16.msra.mxu1 %v650_v58 }
 0x26d   : > { %v695_v11 = vpop.permute.xlu1 %694  ;;  %v685_v15 = vpack.c.bf16 %v683_v14, %v681_v1  ;;  %v684_v16 = vpack.c.bf16 %v682_v13, %v680_v49 }
 0x26e   : > { %v698_v17 = vsel %vm696_vm10, %v691_v35, %v695_v11  ;;  %v700_v18 = vsel %vm696_vm10, %v695_v11, %v691_v35 }
 0x26f   : > { %v716_v20 = vmul.f32 %v707_v61, %v698_v17  ;;  %v717_v21 = vmul.f32 %v711_v44, %v700_v18  ;;  %775 = vmatprep.subr.bf16.mxu1 %v685_v15 }
 0x270   : > { %776 = vmatpush1.bf16.msra.mxu1 %v684_v16 }
 0x271   : > { %v719_v22 = vpack.c.bf16 %v717_v21, %v715_v48  ;;  %v718_v60 = vpack.c.bf16 %v716_v20, %v714_v45 }
 0x273   : > { %777 = vmatprep.subr.bf16.mxu1 %v719_v22 }
 0x274   : > { %778 = vmatpush1.bf16.msra.mxu1 %v718_v60 }
 0x276   : > { %v745_v19 = vpop.permute.xlu0 %744 }
 0x277   : > { %794 = vmatmul.mubr.bf16.vlgmr.msra.gmra.mrb[0].mxu1 %v1753_v50 }
 0x34a   : > { %v795_v23 = vpop.f32.mrb[0].mxu1 }
 0x34b   : > { %v796_v24 = vadd.f32 %v795_v23, %v745_v19  ;;  %v797_v25 = vpop.f32.mrb[1].mxu1 }
 0x34c   : > { %v798_v26 = vadd.f32 %v797_v25, %v745_v19  ;;  %v799_v27 = vpop.f32.mrb[2].mxu1 }
 0x34d   : > { %v802_v28 = vsub.f32 0.0, %v796_v24  ;;  %v800_v31 = vpop.f32.mrb[3].mxu1 }
 0x34e   : > { %v803_v63 = vsub.f32 0.0, %v798_v26 }
 0x34f   : > { %v804_v32 = vmul.f32 1.442695, %v802_v28 }
 0x350   : > { %v806_v33 = vmul.f32 1.442695, %v803_v63 }
 0x351   : > { %1134 = vpow2.f32 %v804_v32 }
 0x352   : > { %1136 = vpow2.f32 %v806_v33 }
 0x35b   : > { %v1135_v34 = vpop.eup %1134 }
 0x35c   : > { %v1137_v35 = vpop.eup %1136  ;;  %v808_v36 = vadd.f32 1.0, %v1135_v34 }
 0x35d   : > { %v809_v37 = vadd.f32 1.0, %v1137_v35 }
 0x35e   : > { %1138 = vrcp.f32 %v808_v36 }
 0x35f   : > { %1140 = vrcp.f32 %v809_v37 }
 0x368   : > { %v1139_v50 = vpop.eup %1138 }
 0x369   : > { %v1141_v59 = vpop.eup %1140  ;;  %v812_v38 = vmul.f32 %v1139_v50, %v796_v24 }
 0x36a   : > { %v813_v29 = vmul.f32 %v1141_v59, %v798_v26 }
 0x36c   : > { %v817_v30 = vcombine.low %v812_v38, %v813_v29 }
 0x36e   : > { %v819_v39 = vadd.f32 %v817_v30, %v814_v62 }
 0x370   : > { %v821_v40 = vcombine.high %v819_v39, %v819_v39 }
 0x372   : > { %v994_v41 = vpack.c.bf16 %v821_v40, %v819_v39 }
 0x374   : > { %995 = vst.sshfl [vmem:[%s336_s17] sm:$0x33 pattern:$0x76325410] %v994_v41 }
 0x375   : > { %1325 = shalt.err (!%p1322_p0)
}
 0x376   : > { %s1326_s30 = scalar_lea.hbm %s1906_s28, 64  ;;  %s1330_s25 = scalar_lea.hbm %s1956_s6, 128 }
 0x377   : > { %p1327_p6 = scmp.ne.s32.totalorder %s1906_s28, %s1326_s30  ;;  %p1331_p8 = scmp.lt.u32.totalorder %s1906_s28, %s1956_s6 }
 0x378   : > { %p1332_p5 = scmp.lt.u32.totalorder %s1330_s25, %s1326_s30  ;;  %p1334_p7 = scmp.lt.u32.totalorder %s1326_s30, %s1906_s28 }
 0x379   : > { %p1328_p10 = pnand %p1327_p6, %p1975_p4 }
 0x37a   : > { %p1333_p9 = por %p1332_p5, %p1331_p8 }
 0x37b   : > { %p1329_p11 = pneg %p1328_p10 }
 0x37c   : > { %p1335_p12 = por %p1334_p7, %p1333_p9 }
 0x37e   : > { %p1336_p13 = pnand %p1335_p12, %p1329_p11 }
 0x380   : > { %1339 = shalt.err (!%p1336_p13)
}
 0x381   : > { %1025 = dma.vmem_to_hbm [thread:$0]  (%p1975_p4), %s1908_s12, 64, %s1906_s28, %s838_s7  }
 0x382 PF: > { %s864_s17 = sand.u32 1, %s1378_s21   ;;  %p1976_p1 = scmp.ne.s32.totalorder %s1966_s26, 0 }
 0x383   : > { %p1977_p3 = scmp.ge.s32.totalorder %s1390_s24, 2  ;;  %s865_s18 = scalar_lea.sflag [#allocation5], %s864_s17 }
 0x385   : > { %p1048_p2 = pnand %p1977_p3, %p1976_p1 }
 0x387   : > { %1373 = dma.done.wait (!%p1048_p2), %s865_s18, 64  }
 0x388   : > { %1375 = vsyncadd (!%p1048_p2), %s865_s18, 4294967232  ;;  %p22_p0 = scmp.ge.s32.totalorder %s1608_s9, 4   ;;  %s1978_s21 = smov %s1382_s22 }
 0x389   : > { %s1979_s22 = smov %s1386_s23  ;;  %s1980_s23 = smov %s1620_s14 }
 0x38a   : > { %s1981_s24 = smov %s1608_s9  ;;  %24 = sbr.rel (!%p22_p0) target bundleno = 8 (0x8), region = 116 }
 0x391   :  { %870 = vsyncpa [#allocation4], 1 }
 0x392   :  { %872 = vsyncpa [#allocation4 + $0x1], 1 }
 0x393   :  { %873 = vsyncpa [#allocation7], 1 }
 0x394   :  { %874 = vsyncpa [#allocation10], 1 }
 0x395   :  { %875 = vsyncpa [#allocation13], 1 }
 0x396   :  { %876 = vsyncpa [#allocation5], 1 }
 0x397   :  { %878 = vsyncpa [#allocation5 + $0x1], 1 }

</bundles_post_ra>
